<compile_context>
chip_gen: v5e
topology: v5e:2x2
jax: 0.10.0
libtpu: 0.0.40
codegen_flags: <defaults>
</compile_context>

<pallas_src>
import functools

import jax
import jax.numpy as jnp
from jax.experimental import pallas as pl
from jax.experimental.pallas import tpu as pltpu

HIDDEN = 128
LANE = 128


def _round_up(n, m):
    return ((n + m - 1) // m) * m


def dqn_kernel(x_ref, w1_ref, b1_ref, w2_ref, b2_ref, w3_ref, b3_ref, o_ref):
    # Fused 3-layer MLP on one [TM, state_size] row tile. MXU matmuls use bf16
    # operands with f32 accumulation; bias add + ReLU stay in f32 on the VPU.
    x = x_ref[...].astype(jnp.bfloat16)                                   # [TM, S]
    h1 = jnp.dot(x, w1_ref[...], preferred_element_type=jnp.float32) + b1_ref[...]
    h1 = jnp.maximum(h1, 0.0).astype(jnp.bfloat16)                        # [TM, 128]
    h2 = jnp.dot(h1, w2_ref[...], preferred_element_type=jnp.float32) + b2_ref[...]
    h2 = jnp.maximum(h2, 0.0).astype(jnp.bfloat16)                        # [TM, 128]
    out = jnp.dot(h2, w3_ref[...], preferred_element_type=jnp.float32) + b3_ref[...]
    o_ref[...] = out.astype(o_ref.dtype)                                  # bf16, lane-dense


def init_params(key, state_size, action_size, hidden=HIDDEN):
    # PyTorch-style uniform bound 1/sqrt(fan_in), weights stored as [in, out].
    ks = jax.random.split(key, 6)

    def linear(kw, kb, fan_in, fan_out):
        bound = 1.0 / jnp.sqrt(fan_in)
        w = jax.random.uniform(kw, (fan_in, fan_out), jnp.float32, -bound, bound)
        b = jax.random.uniform(kb, (1, fan_out), jnp.float32, -bound, bound)
        return w, b

    w1, b1 = linear(ks[0], ks[1], state_size, hidden)
    w2, b2 = linear(ks[2], ks[3], hidden, hidden)
    w3, b3 = linear(ks[4], ks[5], hidden, action_size)
    return (w1, b1, w2, b2, w3, b3)


def prepare_params(params):
    """One-time preparation (call at init, NOT per forward):
    pad the output dim of layer 3 to a full 128-lane width (zero columns) and
    cast weights to bf16; biases stay f32."""
    w1, b1, w2, b2, w3, b3 = params
    action_size = w3.shape[1]
    n_pad = _round_up(action_size, LANE)
    w3p = jnp.zeros((HIDDEN, n_pad), jnp.float32).at[:, :action_size].set(w3)
    b3p = jnp.zeros((1, n_pad), jnp.float32).at[:, :action_size].set(b3)
    return (
        w1.astype(jnp.bfloat16), b1.astype(jnp.float32),
        w2.astype(jnp.bfloat16), b2.astype(jnp.float32),
        w3p.astype(jnp.bfloat16), b3p.astype(jnp.float32),
    )


def _choose_tiling(B, tm_max):
    """Row tile / batch padding. Pads B only to a multiple of 8 (not of TM),
    and prefers >=2 grid steps so v7x can shard the parallel axis across both
    TensorCores (neutral on single-TC v5e/v6e)."""
    b8 = _round_up(max(B, 8), 8)
    steps = pl.cdiv(b8, tm_max)
    if b8 >= 16:
        steps = max(steps, 2)
    tm = _round_up(pl.cdiv(b8, steps), 8)
    b_pad = _round_up(b8, tm)
    return tm, b_pad


@functools.partial(jax.jit, static_argnums=(2, 3))
def dqn_forward(x, prepared, action_size, tm=1024):
    """x: [B, state_size] f32, prepared: output of prepare_params.
    Returns [B, action_size] f32 Q-values."""
    B, S = x.shape
    w1, b1, w2, b2, w3, b3 = prepared
    n_pad = w3.shape[1]

    TM, B_pad = _choose_tiling(B, tm)
    if B_pad != B:
        x_in = jnp.zeros((B_pad, S), x.dtype).at[:B].set(x)
    else:
        x_in = x

    grid = (B_pad // TM,)

    def _const(shape):
        return pl.BlockSpec(shape, lambda i: (0,) * len(shape))

    flops = 2 * B_pad * (S * HIDDEN + HIDDEN * HIDDEN + HIDDEN * n_pad)
    bytes_accessed = (
        B_pad * S * 4                                   # x (f32 in)
        + (w1.size + w2.size + w3.size) * 2             # bf16 weights
        + (b1.size + b2.size + b3.size) * 4             # f32 biases
        + B_pad * n_pad * 2                             # bf16 out
    )

    out = pl.pallas_call(
        dqn_kernel,
        out_shape=jax.ShapeDtypeStruct((B_pad, n_pad), jnp.bfloat16),
        grid=grid,
        in_specs=[
            pl.BlockSpec((TM, S), lambda i: (i, 0)),    # x row tile (pipelined)
            _const(w1.shape), _const(b1.shape),         # weights/biases: VMEM-resident
            _const(w2.shape), _const(b2.shape),
            _const(w3.shape), _const(b3.shape),
        ],
        out_specs=pl.BlockSpec((TM, n_pad), lambda i: (i, 0)),
        compiler_params=pltpu.CompilerParams(
            dimension_semantics=("parallel",),
        ),
        cost_estimate=pl.CostEstimate(
            flops=flops, transcendentals=0, bytes_accessed=bytes_accessed),
    )(x_in, w1, b1, w2, b2, w3, b3)

    # Padded batch rows and padded action lanes are sliced off here; any future
    # in-kernel consumer (e.g. argmax action selection) must mask them instead.
    return out[:B, :action_size].astype(jnp.float32)


def dqn_reference(x, params):
    # Mirrors kernel arithmetic: bf16 matmul operands, f32 accumulation,
    # f32 bias/ReLU, bf16 output rounding.
    w1, b1, w2, b2, w3, b3 = params
    xb = x.astype(jnp.bfloat16)
    h1 = jnp.dot(xb, w1.astype(jnp.bfloat16),
                 preferred_element_type=jnp.float32) + b1
    h1 = jnp.maximum(h1, 0.0).astype(jnp.bfloat16)
    h2 = jnp.dot(h1, w2.astype(jnp.bfloat16),
                 preferred_element_type=jnp.float32) + b2
    h2 = jnp.maximum(h2, 0.0).astype(jnp.bfloat16)
    out = jnp.dot(h2, w3.astype(jnp.bfloat16),
                  preferred_element_type=jnp.float32) + b3
    return out.astype(jnp.bfloat16).astype(jnp.float32)


if __name__ == "__main__":
    key = jax.random.PRNGKey(0)
    kx, kp, kx2 = jax.random.split(key, 3)

    state_size = 32
    action_size = 8
    params = init_params(kp, state_size, action_size)
    prepared = prepare_params(params)   # one-time weight prep (hoisted out of forward)

    # Small batch (single grid step, TM=8).
    batch = 8
    x = jax.random.normal(kx, (batch, state_size), dtype=jnp.float32)
    out = jax.block_until_ready(dqn_forward(x, prepared, action_size))
    ref = dqn_reference(x, params)
    assert out.shape == (batch, action_size)
    assert jnp.allclose(out, ref, atol=1e-2, rtol=1e-2)

    # Larger, awkward batch: exercises multi-step grid without TM-multiple
    # over-padding (1000 rows -> TM=504, B_pad=1008, grid=(2,)).
    batch2 = 1000
    x2 = jax.random.normal(kx2, (batch2, state_size), dtype=jnp.float32)
    out2 = jax.block_until_ready(dqn_forward(x2, prepared, action_size))
    ref2 = dqn_reference(x2, params)
    assert out2.shape == (batch2, action_size)
    assert jnp.allclose(out2, ref2, atol=1e-2, rtol=1e-2)

    print("KERNEL_OK")
</pallas_src>

<mosaic_0001>
module attributes {stable_mosaic.version = 11 : i64} {
  func.func @dqn_kernel(%arg0: i32, %arg1: memref<8x32xf32, #tpu.memory_space<vmem>>, %arg2: memref<32x128xbf16, #tpu.memory_space<vmem>>, %arg3: memref<1x128xf32, #tpu.memory_space<vmem>>, %arg4: memref<128x128xbf16, #tpu.memory_space<vmem>>, %arg5: memref<1x128xf32, #tpu.memory_space<vmem>>, %arg6: memref<128x128xbf16, #tpu.memory_space<vmem>>, %arg7: memref<1x128xf32, #tpu.memory_space<vmem>>, %arg8: memref<8x128xbf16, #tpu.memory_space<vmem>>) attributes {dimension_semantics = [#tpu.dimension_semantics<parallel>], iteration_bounds = array<i64: 1>, scalar_prefetch = 0 : i64, scratch_operands = 0 : i64, tpu.core_type = #tpu.core_type<tc>, window_params = [{transform_indices = @transform_0, window_bounds = array<i64: 8, 32>}, {pipeline_mode = #tpu.pipeline_mode<synchronous>, transform_indices = @transform_1, window_bounds = array<i64: 32, 128>}, {pipeline_mode = #tpu.pipeline_mode<synchronous>, transform_indices = @transform_2, window_bounds = array<i64: 1, 128>}, {pipeline_mode = #tpu.pipeline_mode<synchronous>, transform_indices = @transform_3, window_bounds = array<i64: 128, 128>}, {pipeline_mode = #tpu.pipeline_mode<synchronous>, transform_indices = @transform_4, window_bounds = array<i64: 1, 128>}, {pipeline_mode = #tpu.pipeline_mode<synchronous>, transform_indices = @transform_5, window_bounds = array<i64: 128, 128>}, {pipeline_mode = #tpu.pipeline_mode<synchronous>, transform_indices = @transform_6, window_bounds = array<i64: 1, 128>}, {transform_indices = @transform_7, window_bounds = array<i64: 8, 128>}]} {
    %c0 = arith.constant 0 : index
    %c0_0 = arith.constant 0 : index
    %0 = vector.load %arg1[%c0, %c0_0] : memref<8x32xf32, #tpu.memory_space<vmem>>, vector<8x32xf32>
    %1 = arith.truncf %0 : vector<8x32xf32> to vector<8x32xbf16>
    %c0_1 = arith.constant 0 : index
    %c0_2 = arith.constant 0 : index
    %2 = vector.load %arg2[%c0_1, %c0_2] : memref<32x128xbf16, #tpu.memory_space<vmem>>, vector<32x128xbf16>
    %cst = arith.constant dense<0.000000e+00> : vector<8x128xf32>
    %3 = tpu.matmul %1, %2, %cst {dimension_numbers = #tpu.dot_dimension_numbers<[1], [0], [0], [1], [0, 0, 1, 1], [], []>} : vector<8x32xbf16>, vector<32x128xbf16>, vector<8x128xf32> -> vector<8x128xf32>
    %c0_3 = arith.constant 0 : index
    %c0_4 = arith.constant 0 : index
    %4 = vector.load %arg3[%c0_3, %c0_4] : memref<1x128xf32, #tpu.memory_space<vmem>>, vector<1x128xf32>
    %5 = vector.broadcast %4 : vector<1x128xf32> to vector<8x128xf32>
    %6 = arith.addf %3, %5 : vector<8x128xf32>
    %cst_5 = arith.constant 0.000000e+00 : f32
    %7 = vector.broadcast %cst_5 : f32 to vector<8x128xf32>
    %8 = arith.maximumf %6, %7 : vector<8x128xf32>
    %9 = arith.truncf %8 : vector<8x128xf32> to vector<8x128xbf16>
    %c0_6 = arith.constant 0 : index
    %c0_7 = arith.constant 0 : index
    %10 = vector.load %arg4[%c0_6, %c0_7] : memref<128x128xbf16, #tpu.memory_space<vmem>>, vector<128x128xbf16>
    %cst_8 = arith.constant dense<0.000000e+00> : vector<8x128xf32>
    %11 = tpu.matmul %9, %10, %cst_8 {dimension_numbers = #tpu.dot_dimension_numbers<[1], [0], [0], [1], [0, 0, 1, 1], [], []>} : vector<8x128xbf16>, vector<128x128xbf16>, vector<8x128xf32> -> vector<8x128xf32>
    %c0_9 = arith.constant 0 : index
    %c0_10 = arith.constant 0 : index
    %12 = vector.load %arg5[%c0_9, %c0_10] : memref<1x128xf32, #tpu.memory_space<vmem>>, vector<1x128xf32>
    %13 = vector.broadcast %12 : vector<1x128xf32> to vector<8x128xf32>
    %14 = arith.addf %11, %13 : vector<8x128xf32>
    %cst_11 = arith.constant 0.000000e+00 : f32
    %15 = vector.broadcast %cst_11 : f32 to vector<8x128xf32>
    %16 = arith.maximumf %14, %15 : vector<8x128xf32>
    %17 = arith.truncf %16 : vector<8x128xf32> to vector<8x128xbf16>
    %c0_12 = arith.constant 0 : index
    %c0_13 = arith.constant 0 : index
    %18 = vector.load %arg6[%c0_12, %c0_13] : memref<128x128xbf16, #tpu.memory_space<vmem>>, vector<128x128xbf16>
    %cst_14 = arith.constant dense<0.000000e+00> : vector<8x128xf32>
    %19 = tpu.matmul %17, %18, %cst_14 {dimension_numbers = #tpu.dot_dimension_numbers<[1], [0], [0], [1], [0, 0, 1, 1], [], []>} : vector<8x128xbf16>, vector<128x128xbf16>, vector<8x128xf32> -> vector<8x128xf32>
    %c0_15 = arith.constant 0 : index
    %c0_16 = arith.constant 0 : index
    %20 = vector.load %arg7[%c0_15, %c0_16] : memref<1x128xf32, #tpu.memory_space<vmem>>, vector<1x128xf32>
    %21 = vector.broadcast %20 : vector<1x128xf32> to vector<8x128xf32>
    %22 = arith.addf %19, %21 : vector<8x128xf32>
    %23 = arith.truncf %22 : vector<8x128xf32> to vector<8x128xbf16>
    %c0_17 = arith.constant 0 : index
    %c0_18 = arith.constant 0 : index
    %24 = vector.load %arg8[%c0_17, %c0_18] : memref<8x128xbf16, #tpu.memory_space<vmem>>, vector<8x128xbf16>
    tpu.vector_store %arg8[%c0_17, %c0_18], %23 {strides = array<i32>} : memref<8x128xbf16, #tpu.memory_space<vmem>>, vector<8x128xbf16>,
    return
  }
  func.func @transform_0(%arg0: i32) -> (i32, i32) {
    %c0_i32 = arith.constant 0 : i32
    %c0_i32_0 = arith.constant 0 : i32
    return %arg0, %c0_i32 : i32, i32
  }
  func.func @transform_1(%arg0: i32) -> (i32, i32) {
    %c0_i32 = arith.constant 0 : i32
    %c0_i32_0 = arith.constant 0 : i32
    %c0_i32_1 = arith.constant 0 : i32
    return %c0_i32, %c0_i32_0 : i32, i32
  }
  func.func @transform_2(%arg0: i32) -> (i32, i32) {
    %c0_i32 = arith.constant 0 : i32
    %c0_i32_0 = arith.constant 0 : i32
    %c0_i32_1 = arith.constant 0 : i32
    return %c0_i32, %c0_i32_0 : i32, i32
  }
  func.func @transform_3(%arg0: i32) -> (i32, i32) {
    %c0_i32 = arith.constant 0 : i32
    %c0_i32_0 = arith.constant 0 : i32
    %c0_i32_1 = arith.constant 0 : i32
    return %c0_i32, %c0_i32_0 : i32, i32
  }
  func.func @transform_4(%arg0: i32) -> (i32, i32) {
    %c0_i32 = arith.constant 0 : i32
    %c0_i32_0 = arith.constant 0 : i32
    %c0_i32_1 = arith.constant 0 : i32
    return %c0_i32, %c0_i32_0 : i32, i32
  }
  func.func @transform_5(%arg0: i32) -> (i32, i32) {
    %c0_i32 = arith.constant 0 : i32
    %c0_i32_0 = arith.constant 0 : i32
    %c0_i32_1 = arith.constant 0 : i32
    return %c0_i32, %c0_i32_0 : i32, i32
  }
  func.func @transform_6(%arg0: i32) -> (i32, i32) {
    %c0_i32 = arith.constant 0 : i32
    %c0_i32_0 = arith.constant 0 : i32
    %c0_i32_1 = arith.constant 0 : i32
    return %c0_i32, %c0_i32_0 : i32, i32
  }
  func.func @transform_7(%arg0: i32) -> (i32, i32) {
    %c0_i32 = arith.constant 0 : i32
    %c0_i32_0 = arith.constant 0 : i32
    return %arg0, %c0_i32 : i32, i32
  }
}

</mosaic_0001>

<bundles_post_ra>
// kernel: dqn_forward.1
= control target key start
LH: loop header
LB: loop body
LE: loop exit
PB: predicated region body
PF: predicated region fallthrough
CT: control target
= control target key end

     0   :  { %12 = vsyncpa [#allocation3], 0  ;;  %s574_s0 = inlined_call_operand.hbm [shape: f32[8,32], index: 0, kind: input, shape index: {}]   ;;  %s575_s1 = inlined_call_operand.hbm [shape: bf16[32,128], index: 1, kind: input, shape index: {}]   ;;  %s576_s2 = inlined_call_operand.vmem [shape: f32[1,128], index: 2, kind: input, shape index: {}]   ;;  %s577_s3 = inlined_call_operand.hbm [shape: bf16[128,128], index: 3, kind: input, shape index: {}]   ;;  %s578_s4 = inlined_call_operand.vmem [shape: f32[1,128], index: 4, kind: input, shape index: {}]   ;;  %s579_s5 = inlined_call_operand.hbm [shape: bf16[128,128], index: 5, kind: input, shape index: {}]   ;;  %s580_s6 = inlined_call_operand.vmem [shape: f32[1,128], index: 6, kind: input, shape index: {}]   ;;  %s581_s7 = inlined_call_operand.vmem [shape: bf16[8,128], index: 7, kind: output, shape index: {}]  }
   0x1   :  { %13 = vsyncpa [#allocation5], 0  ;;  %s30_s26 = sshll.u32 %s575_s1, 4  ;;  %s31_s26 = int_to_ptr.hbm [resolvable:$true] %s30_s26 }
   0x2   :  { %14 = vsyncpa [#allocation8], 0  ;;  %s504_s27 = smov [#allocation4]   ;;  %s20_s8 = sshll.u32 %s574_s0, 4  ;;  %s21_s8 = int_to_ptr.hbm [resolvable:$true] %s20_s8 }
   0x3   :  { %s32_s28 = sshll.u32 %s504_s27, 4  ;;  %s505_s9 = smov 64   ;;  %s33_s28 = int_to_ptr.vmem [resolvable:$true] %s32_s28 }
   0x4   :  { %s506_s10 = smov 4   ;;  %s507_s11 = smov [#allocation2]  }
   0x5   :  { %38 = dma.hbm_to_vmem [thread:$0]  %s31_s26, 256, %s33_s28, [#allocation5], %s505_s9, %s505_s9, %s506_s10  }
   0x6   :  { %s22_s12 = sshll.u32 %s507_s11, 4  ;;  %s45_s15 = sshll.u32 %s577_s3, 4  ;;  %s23_s12 = int_to_ptr.vmem [resolvable:$true] %s22_s12  ;;  %s46_s15 = int_to_ptr.hbm [resolvable:$true] %s45_s15 }
   0x7   :  { %25 = dma.hbm_to_vmem [thread:$0]  %s21_s8, 128, %s23_s12, [#allocation3]  }
   0x8   :  { %s60_s17 = sshll.u32 %s579_s5, 4  ;;  %s508_s18 = smov [#allocation6]   ;;  %s61_s17 = int_to_ptr.hbm [resolvable:$true] %s60_s17 }
   0x9   :  { %s47_s19 = sshll.u32 %s508_s18, 4  ;;  %s509_s0 = smov [#allocation7]   ;;  %s48_s19 = int_to_ptr.vmem [resolvable:$true] %s47_s19 }
   0xa   :  { %53 = dma.hbm_to_vmem [thread:$0]  %s46_s15, 1024, %s48_s19, [#allocation5], %s505_s9, %s505_s9, %s506_s10  }
   0xb   :  { %s62_s20 = sshll.u32 %s509_s0, 4  ;;  %s63_s20 = int_to_ptr.vmem [resolvable:$true] %s62_s20 }
   0xc   :  { %68 = dma.hbm_to_vmem [thread:$0]  %s61_s17, 1024, %s63_s20, [#allocation8], %s505_s9, %s505_s9, %s506_s10  }
   0xd   :  { %498 = dma.done.wait [#allocation3], 128  }
   0xe   :  { %499 = vsyncadd [#allocation3], 4294967168 }
   0xf   :  { %500 = dma.done.wait [#allocation5], 1280  }
  0x10   :  { %501 = vsyncadd [#allocation5], 4294966016 }
  0x11   :  { %502 = dma.done.wait [#allocation8], 1024  }
  0x12   :  { %503 = vsyncadd [#allocation8], 4294966272  ;;  %v376_v0 = vld [vmem:[#allocation4 + $0x8] sm:$0xff]  ;;  %v375_v2 = vld [vmem:[#allocation4] sm:$0xff]  ;;  %vm110_vm0 = vcmask 261120  }
  0x13   :  { %v384_v1 = vld [vmem:[#allocation6 + $0x38] sm:$0xff]  ;;  %120 = vmatpush.bf16.msra.mxu0 %v376_v0  ;;  %v88_v3 = vld [vmem:[#allocation2] sm:$0xff]  ;;  %v383_v4 = vld [vmem:[#allocation6 + $0x30] sm:$0xff] }
  0x14   :  { %197 = vmatpush.bf16.msra.mxu1 %v384_v1  ;;  %v89_v5 = vpack.c.bf16 %v88_v3, %v88_v3  ;;  %v382_v6 = vld [vmem:[#allocation6 + $0x28] sm:$0xff]  ;;  %v381_v7 = vld [vmem:[#allocation6 + $0x20] sm:$0xff]  ;;  %v380_v8 = vld [vmem:[#allocation6 + $0x18] sm:$0xff] }
  0x15   :  { %v379_v9 = vld [vmem:[#allocation6 + $0x10] sm:$0xff]  ;;  %v378_v10 = vld [vmem:[#allocation6 + $0x8] sm:$0xff]  ;;  %v377_v11 = vld [vmem:[#allocation6] sm:$0xff] }
  0x16   :  { %v392_v12 = vld [vmem:[#allocation7 + $0x38] sm:$0xff]  ;;  %v391_v13 = vld [vmem:[#allocation7 + $0x30] sm:$0xff]  ;;  %v390_v14 = vld [vmem:[#allocation7 + $0x28] sm:$0xff] }
  0x17   :  { %121 = vmatpush.bf16.msra.mxu0 %v375_v2  ;;  %280 = vmatpush.bf16.msra.mxu2 %v392_v12  ;;  %v389_v15 = vld [vmem:[#allocation7 + $0x20] sm:$0xff]  ;;  %v388_v16 = vld [vmem:[#allocation7 + $0x18] sm:$0xff]  ;;  %v387_v17 = vld [vmem:[#allocation7 + $0x10] sm:$0xff] }
  0x18   :  { %198 = vmatpush.bf16.msra.mxu1 %v383_v4  ;;  %v399_v18 = vld [vmem:[%s576_s2] ss:$0 sm:$0xff]  ;;  %v385_v25 = vld [vmem:[#allocation7] sm:$0xff] }
  0x19   :  { %v386_v24 = vld [vmem:[#allocation7 + $0x8] sm:$0xff] }
  0x1a   :  { %310 = vmatmul.msk.bf16.vlgmr.msra.gmra.mxu0 %vm110_vm0, %v89_v5  ;;  %v400_v26 = vld [vmem:[%s578_s4] ss:$0 sm:$0xff] }
  0x1b   :  { %281 = vmatpush.bf16.msra.mxu2 %v391_v13  ;;  %v401_v32 = vld [vmem:[%s580_s6] ss:$0 sm:$0xff] }
  0x1c   :  { %199 = vmatpush.bf16.msra.mxu1 %v382_v6 }
  0x1f   :  { %282 = vmatpush.bf16.msra.mxu2 %v390_v14 }
  0x20   :  { %200 = vmatpush.bf16.msra.mxu1 %v381_v7 }
  0x23   :  { %283 = vmatpush.bf16.msra.mxu2 %v389_v15 }
  0x24   :  { %201 = vmatpush.bf16.msra.mxu1 %v380_v8 }
  0x27   :  { %284 = vmatpush.bf16.msra.mxu2 %v388_v16 }
  0x28   :  { %202 = vmatpush.bf16.msra.mxu1 %v379_v9 }
  0x2b   :  { %285 = vmatpush.bf16.msra.mxu2 %v387_v17 }
  0x2c   :  { %203 = vmatpush.bf16.msra.mxu1 %v378_v10 }
  0x2f   :  { %286 = vmatpush.bf16.msra.mxu2 %v386_v24 }
  0x30   :  { %204 = vmatpush.bf16.msra.mxu1 %v377_v11 }
  0x33   :  { %287 = vmatpush.bf16.msra.mxu2 %v385_v25 }
  0x97   :  { %v123_v19 = vpop.f32.mrf.mxu0 }
  0x98   :  { %v124_v20 = vadd.f32 %v399_v18, %v123_v19 }
  0x9a   :  { %v127_v21 = vmax.f32 %v124_v20, 0.0 }
  0x9c   :  { %v128_v22 = vpack.c.bf16 %v127_v21, %v127_v21 }
  0x9e   :  { %205 = vmatmul.bf16.vlgmr.msra.gmra.mxu1 %v128_v22 }
  0x9f   :  { %v125_v23 = vpop.f32.mrf.mxu0 }
 0x11b   :  { %v206_v27 = vpop.f32.mrf.mxu1 }
 0x11c   :  { %v207_v28 = vadd.f32 %v400_v26, %v206_v27 }
 0x11e   :  { %v210_v29 = vmax.f32 %v207_v28, 0.0 }
 0x120   :  { %v211_v30 = vpack.c.bf16 %v210_v29, %v210_v29 }
 0x122   :  { %288 = vmatmul.bf16.vlgmr.msra.gmra.mxu2 %v211_v30 }
 0x123   :  { %v208_v31 = vpop.f32.mrf.mxu1 }
 0x1a5   :  { %v289_v33 = vpop.f32.mrf.mxu2 }
 0x1a6   :  { %v290_v34 = vadd.f32 %v401_v32, %v289_v33 }
 0x1a8   :  { %v293_v35 = vpack.c.bf16 %v290_v34, %v290_v34 }
 0x1aa   :  { %294 = vst [vmem:[%s581_s7] sm:$0xf] %v293_v35 }
 0x1ad   :  { %v291_v36 = vpop.f32.mrf.mxu2 }
 0x1ae   :  { %299 = vsyncpa [#allocation3], 1 }
 0x1af   :  { %300 = vsyncpa [#allocation5], 1 }
 0x1b0   :  { %301 = vsyncpa [#allocation8], 1 }

</bundles_post_ra>
